<compile_context>
chip_gen: v7x
topology: tpu7x:2x2x1
jax: 0.10.0
libtpu: 0.0.40
codegen_flags: <defaults>
</compile_context>

<pallas_src>
import functools

import jax
import jax.numpy as jnp
from jax import lax
from jax.experimental import pallas as pl
from jax.experimental.pallas import tpu as pltpu


# ------------------------------ helpers -----------------------------------

def _vmem_budget_bytes():
    """Per-generation scoped-VMEM budget (v7x has only 64 MiB/TC)."""
    try:
        cap = pltpu.get_tpu_info().vmem_capacity_bytes
    except Exception:
        cap = 64 * 1024 * 1024          # assume the smallest (v7x) if query fails
    return min((cap * 3) // 4, 96 * 1024 * 1024)


def _pick_q_tile(lq, per_step_bytes, budget):
    """Largest q tile that exactly divides Lq and fits the VMEM budget."""
    divisors = [t for t in (1024, 512, 256, 128, 64, 32, 16, 8) if lq % t == 0]
    if not divisors:
        return lq                        # full-extent block is always legal
    for t in divisors:                   # descending: biggest tile first
        if per_step_bytes(t) <= budget:
            return t
    # TODO(synk): if even the smallest divisor does not fit (very long Lk on
    # v7x), a K-tiled online-softmax variant is needed; not required here.
    return divisors[-1]


# ------------------------------ kernels ------------------------------------

def _sdpa_kernel(q_ref, k_ref, v_ref, o_ref, a_ref, *, inv_temp):
    q = q_ref[0] * inv_temp                          # (tq, Dk), native dtype
    k = k_ref[0]                                     # (Lk, Dk), native dtype
    v = v_ref[0]                                     # (Lk, Dv)
    # scores = (q / temperature) @ k^T, f32 accumulation on the MXU
    s = lax.dot_general(q, k, (((1,), (1,)), ((), ())),
                        preferred_element_type=jnp.float32)
    m = jnp.max(s, axis=-1, keepdims=True)
    e = jnp.exp(s - m)
    r = pl.reciprocal(jnp.sum(e, axis=-1, keepdims=True), approx=True)
    p = e * r                                        # softmax over keys
    # TODO(synk): nn.Dropout(p=0.1) is a no-op in eval/inference mode; a
    # training-mode kernel would draw a keep-mask via pltpu.prng_seed +
    # pltpu.prng_random_bits here.
    p_lo = p.astype(v.dtype)                         # single cast, reused twice
    a_ref[0] = p_lo.astype(a_ref.dtype)
    o_ref[0] = jnp.dot(p_lo, v,
                       preferred_element_type=jnp.float32).astype(o_ref.dtype)


def _sdpa_kernel_masked(q_ref, k_ref, v_ref, m_ref, o_ref, a_ref, *, inv_temp):
    q = q_ref[0] * inv_temp
    k = k_ref[0]
    v = v_ref[0]
    s = lax.dot_general(q, k, (((1,), (1,)), ((), ())),
                        preferred_element_type=jnp.float32)
    # torch masked_fill(mask, -inf): mask != 0 -> -inf (matches reference; a
    # fully-masked row yields NaN exactly like the PyTorch module would).
    s = jnp.where(m_ref[0] != 0, -jnp.inf, s)
    m = jnp.max(s, axis=-1, keepdims=True)
    e = jnp.exp(s - m)
    r = pl.reciprocal(jnp.sum(e, axis=-1, keepdims=True), approx=True)
    p = e * r
    p_lo = p.astype(v.dtype)
    a_ref[0] = p_lo.astype(a_ref.dtype)
    o_ref[0] = jnp.dot(p_lo, v,
                       preferred_element_type=jnp.float32).astype(o_ref.dtype)


# ------------------------------ wrapper -------------------------------------

def scaled_dot_product_attention(q, k, v, temperature, mask=None):
    """q:(B,Lq,Dk), k:(B,Lk,Dk), v:(B,Lk,Dv), mask:(B,Lq,Lk) bool/int or None.

    Returns (output:(B,Lq,Dv), attn:(B,Lq,Lk)) matching the PyTorch module in
    eval mode (dropout is identity).
    """
    B, Lq, Dk = q.shape
    Bk, Lk, Dk2 = k.shape
    Bv, Lk2, Dv = v.shape
    assert B == Bk == Bv and Dk == Dk2 and Lk == Lk2

    itemsize = jnp.dtype(q.dtype).itemsize
    budget = _vmem_budget_bytes()

    def per_step_bytes(tq):
        db = 2                                        # default double buffering
        fixed = db * (Lk * Dk + Lk * Dv) * itemsize   # resident K + V blocks
        per_row = db * (Dk + Dv + Lk) * itemsize      # q, out, attn blocks
        if mask is not None:
            per_row += db * Lk * 1                    # int8 mask block
        per_row += 3 * Lk * 4                         # f32 s/e/p temporaries
        return fixed + tq * per_row

    tq = _pick_q_tile(Lq, per_step_bytes, int(budget * 0.9))
    grid = (B, Lq // tq)
    inv_temp = float(1.0 / float(temperature))

    # K / V are invariant across the q-tile axis; when their double-buffered
    # footprint is large (v7x / long Lk) fall back to single buffering.
    kv_single_buffer = 2 * (Lk * Dk + Lk * Dv) * itemsize > budget // 2

    q_spec = pl.BlockSpec((1, tq, Dk), lambda b, i: (b, i, 0))
    if kv_single_buffer:
        k_spec = pl.BlockSpec((1, Lk, Dk), lambda b, i: (b, 0, 0),
                              pipeline_mode=pl.Buffered(1))
        v_spec = pl.BlockSpec((1, Lk, Dv), lambda b, i: (b, 0, 0),
                              pipeline_mode=pl.Buffered(1))
    else:
        k_spec = pl.BlockSpec((1, Lk, Dk), lambda b, i: (b, 0, 0))
        v_spec = pl.BlockSpec((1, Lk, Dv), lambda b, i: (b, 0, 0))
    o_spec = pl.BlockSpec((1, tq, Dv), lambda b, i: (b, i, 0))
    # NOTE: attn writeback is lane-dense (unmasked vst) only when Lk % 128 == 0;
    # padding Lk at the module boundary would change the returned shape, so we
    # keep the exact semantics and accept masked stores for odd Lk.
    a_spec = pl.BlockSpec((1, tq, Lk), lambda b, i: (b, i, 0))

    out_shape = (jax.ShapeDtypeStruct((B, Lq, Dv), q.dtype),
                 jax.ShapeDtypeStruct((B, Lq, Lk), q.dtype))

    if mask is None:
        kern = functools.partial(_sdpa_kernel, inv_temp=inv_temp)
        in_specs = [q_spec, k_spec, v_spec]
        args = (q, k, v)
    else:
        # int8 mask cuts the dominant HBM read 4x vs int32; int8 needs the
        # sublane dim to be a multiple of 32 or a full-extent block.
        mask_dtype = jnp.int8 if (tq % 32 == 0 or tq == Lq) else jnp.int32
        kern = functools.partial(_sdpa_kernel_masked, inv_temp=inv_temp)
        m_spec = pl.BlockSpec((1, tq, Lk), lambda b, i: (b, i, 0))
        in_specs = [q_spec, k_spec, v_spec, m_spec]
        args = (q, k, v, mask.astype(mask_dtype))

    if B >= 2:
        # Megacore: shard the batch axis so each core streams a disjoint K/V.
        dims = ("parallel", "arbitrary")
    else:
        dims = ("arbitrary", "parallel")

    out, attn = pl.pallas_call(
        kern,
        out_shape=out_shape,
        grid_spec=pltpu.PrefetchScalarGridSpec(
            num_scalar_prefetch=0,
            grid=grid,
            in_specs=in_specs,
            out_specs=[o_spec, a_spec]),
        compiler_params=pltpu.CompilerParams(
            dimension_semantics=dims,
            vmem_limit_bytes=budget),
    )(*args)
    return out, attn


# ------------------------------ reference -----------------------------------

def sdpa_reference(q, k, v, temperature, mask=None):
    attn = jnp.einsum('bqd,bkd->bqk', q, k) / temperature
    if mask is not None:
        attn = jnp.where(mask, -jnp.inf, attn)
    attn = jax.nn.softmax(attn, axis=2)
    out = jnp.einsum('bqk,bkd->bqd', attn, v)
    return out, attn


# ------------------------------ demo / test ----------------------------------

if __name__ == "__main__":
    key = jax.random.PRNGKey(0)
    kq, kk, kv = jax.random.split(key, 3)
    B, Lq, Lk, Dk, Dv = 2, 128, 128, 32, 32
    q = jax.random.normal(kq, (B, Lq, Dk), jnp.float32)
    k = jax.random.normal(kk, (B, Lk, Dk), jnp.float32)
    v = jax.random.normal(kv, (B, Lk, Dv), jnp.float32)
    temperature = Dk ** 0.5

    tol = dict(atol=2e-3, rtol=2e-3)   # approx reciprocal: ~2^-11 rel. error

    # unmasked path
    fwd = jax.jit(lambda q_, k_, v_: scaled_dot_product_attention(
        q_, k_, v_, temperature))
    out, attn = jax.block_until_ready(fwd(q, k, v))
    ref_out, ref_attn = sdpa_reference(q, k, v, temperature)
    assert out.shape == (B, Lq, Dv) and attn.shape == (B, Lq, Lk)
    assert bool(jnp.allclose(out, ref_out, **tol))
    assert bool(jnp.allclose(attn, ref_attn, **tol))
    assert bool(jnp.all(jnp.isfinite(out)))

    # masked path (causal mask; True == masked out, as in torch.masked_fill)
    mask2d = jnp.triu(jnp.ones((Lq, Lk), dtype=jnp.bool_), k=1)
    mask = jnp.tile(mask2d[None], (B, 1, 1))
    fwd_m = jax.jit(lambda q_, k_, v_, m_: scaled_dot_product_attention(
        q_, k_, v_, temperature, m_))
    out_m, attn_m = jax.block_until_ready(fwd_m(q, k, v, mask))
    ref_out_m, ref_attn_m = sdpa_reference(q, k, v, temperature, mask)
    assert bool(jnp.allclose(out_m, ref_out_m, **tol))
    assert bool(jnp.allclose(attn_m, ref_attn_m, **tol))
    assert bool(jnp.all(jnp.isfinite(out_m)))

    print("KERNEL_OK")
</pallas_src>

<mosaic_0001>
module attributes {stable_mosaic.version = 11 : i64} {
  func.func @_sdpa_kernel(%arg0: i32, %arg1: i32, %arg2: memref<1x128x32xf32, #tpu.memory_space<vmem>>, %arg3: memref<1x128x32xf32, #tpu.memory_space<vmem>>, %arg4: memref<1x128x32xf32, #tpu.memory_space<vmem>>, %arg5: memref<1x128x32xf32, #tpu.memory_space<vmem>>, %arg6: memref<1x128x128xf32, #tpu.memory_space<vmem>>) attributes {dimension_semantics = [#tpu.dimension_semantics<parallel>, #tpu.dimension_semantics<arbitrary>], iteration_bounds = array<i64: 2, 1>, scalar_prefetch = 0 : i64, scratch_operands = 0 : i64, tpu.core_type = #tpu.core_type<tc>, window_params = [{transform_indices = @transform_0, window_bounds = array<i64: 1, 128, 32>}, {transform_indices = @transform_1, window_bounds = array<i64: 1, 128, 32>}, {transform_indices = @transform_2, window_bounds = array<i64: 1, 128, 32>}, {transform_indices = @transform_3, window_bounds = array<i64: 1, 128, 32>}, {transform_indices = @transform_4, window_bounds = array<i64: 1, 128, 128>}]} {
    %c0 = arith.constant 0 : index
    %c0_0 = arith.constant 0 : index
    %c0_1 = arith.constant 0 : index
    %0 = vector.load %arg2[%c0, %c0_0, %c0_1] : memref<1x128x32xf32, #tpu.memory_space<vmem>>, vector<1x128x32xf32>
    %1 = vector.shape_cast %0 : vector<1x128x32xf32> to vector<128x32xf32>
    %cst = arith.constant 0.176776692 : f32
    %2 = vector.broadcast %cst : f32 to vector<128x32xf32>
    %3 = arith.mulf %1, %2 : vector<128x32xf32>
    %c0_2 = arith.constant 0 : index
    %c0_3 = arith.constant 0 : index
    %c0_4 = arith.constant 0 : index
    %4 = vector.load %arg3[%c0_2, %c0_3, %c0_4] : memref<1x128x32xf32, #tpu.memory_space<vmem>>, vector<1x128x32xf32>
    %5 = vector.shape_cast %4 : vector<1x128x32xf32> to vector<128x32xf32>
    %c0_5 = arith.constant 0 : index
    %c0_6 = arith.constant 0 : index
    %c0_7 = arith.constant 0 : index
    %6 = vector.load %arg4[%c0_5, %c0_6, %c0_7] : memref<1x128x32xf32, #tpu.memory_space<vmem>>, vector<1x128x32xf32>
    %7 = vector.shape_cast %6 : vector<1x128x32xf32> to vector<128x32xf32>
    %cst_8 = arith.constant dense<0.000000e+00> : vector<128x128xf32>
    %8 = tpu.matmul %3, %5, %cst_8 {dimension_numbers = #tpu.dot_dimension_numbers<[1], [1], [0], [0], [0, 0, 1, 0], [], []>} : vector<128x32xf32>, vector<128x32xf32>, vector<128x128xf32> -> vector<128x128xf32>
    %cst_9 = arith.constant dense<0xFF800000> : vector<128xf32>
    %9 = vector.multi_reduction <maximumf>, %8, %cst_9 [1] : vector<128x128xf32> to vector<128xf32>
    %10 = vector.shape_cast %9 : vector<128xf32> to vector<128x1xf32>
    %11 = vector.broadcast %10 : vector<128x1xf32> to vector<128x128xf32>
    %12 = arith.subf %8, %11 : vector<128x128xf32>
    %13 = math.exp %12 : vector<128x128xf32>
    %cst_10 = arith.constant dense<0.000000e+00> : vector<128xf32>
    %14 = vector.multi_reduction <add>, %13, %cst_10 [1] : vector<128x128xf32> to vector<128xf32>
    %15 = vector.shape_cast %14 : vector<128xf32> to vector<128x1xf32>
    %16 = tpu.reciprocal %15 {approx = true} : vector<128x1xf32> -> vector<128x1xf32>
    %17 = vector.broadcast %16 : vector<128x1xf32> to vector<128x128xf32>
    %18 = arith.mulf %13, %17 : vector<128x128xf32>
    %c0_11 = arith.constant 0 : index
    %c0_12 = arith.constant 0 : index
    %c0_13 = arith.constant 0 : index
    %19 = vector.load %arg6[%c0_11, %c0_12, %c0_13] : memref<1x128x128xf32, #tpu.memory_space<vmem>>, vector<1x128x128xf32>
    %20 = vector.shape_cast %19 : vector<1x128x128xf32> to vector<128x128xf32>
    %21 = vector.shape_cast %18 : vector<128x128xf32> to vector<1x128x128xf32>
    tpu.vector_store %arg6[%c0_11, %c0_12, %c0_13], %21 {strides = array<i32>} : memref<1x128x128xf32, #tpu.memory_space<vmem>>, vector<1x128x128xf32>,
    %cst_14 = arith.constant dense<0.000000e+00> : vector<128x32xf32>
    %22 = tpu.matmul %18, %7, %cst_14 {dimension_numbers = #tpu.dot_dimension_numbers<[1], [0], [0], [1], [0, 0, 1, 1], [], []>} : vector<128x128xf32>, vector<128x32xf32>, vector<128x32xf32> -> vector<128x32xf32>
    %c0_15 = arith.constant 0 : index
    %c0_16 = arith.constant 0 : index
    %c0_17 = arith.constant 0 : index
    %23 = vector.load %arg5[%c0_15, %c0_16, %c0_17] : memref<1x128x32xf32, #tpu.memory_space<vmem>>, vector<1x128x32xf32>
    %24 = vector.shape_cast %23 : vector<1x128x32xf32> to vector<128x32xf32>
    %25 = vector.shape_cast %22 : vector<128x32xf32> to vector<1x128x32xf32>
    tpu.vector_store %arg5[%c0_15, %c0_16, %c0_17], %25 {strides = array<i32>} : memref<1x128x32xf32, #tpu.memory_space<vmem>>, vector<1x128x32xf32>,
    return
  }
  func.func @transform_0(%arg0: i32, %arg1: i32) -> (i32, i32, i32) {
    %c0_i32 = arith.constant 0 : i32
    %c0_i32_0 = arith.constant 0 : i32
    return %arg0, %arg1, %c0_i32 : i32, i32, i32
  }
  func.func @transform_1(%arg0: i32, %arg1: i32) -> (i32, i32, i32) {
    %c0_i32 = arith.constant 0 : i32
    %c0_i32_0 = arith.constant 0 : i32
    %c0_i32_1 = arith.constant 0 : i32
    return %arg0, %c0_i32, %c0_i32_0 : i32, i32, i32
  }
  func.func @transform_2(%arg0: i32, %arg1: i32) -> (i32, i32, i32) {
    %c0_i32 = arith.constant 0 : i32
    %c0_i32_0 = arith.constant 0 : i32
    %c0_i32_1 = arith.constant 0 : i32
    return %arg0, %c0_i32, %c0_i32_0 : i32, i32, i32
  }
  func.func @transform_3(%arg0: i32, %arg1: i32) -> (i32, i32, i32) {
    %c0_i32 = arith.constant 0 : i32
    %c0_i32_0 = arith.constant 0 : i32
    return %arg0, %arg1, %c0_i32 : i32, i32, i32
  }
  func.func @transform_4(%arg0: i32, %arg1: i32) -> (i32, i32, i32) {
    %c0_i32 = arith.constant 0 : i32
    %c0_i32_0 = arith.constant 0 : i32
    return %arg0, %arg1, %c0_i32 : i32, i32, i32
  }
}

</mosaic_0001>

<bundles_post_ra>
// kernel: _lambda_.1
= control target key start
LH: loop header
LB: loop body
LE: loop exit
PB: predicated region body
PF: predicated region fallthrough
CT: control target
= control target key end

     0   :  { %10 = vsyncpa [#allocation3], 0  ;;  %s2035_s0 = inlined_call_operand.vmem [shape: f32[2,128,32], index: 0, kind: input, shape index: {}]   ;;  %s2036_s1 = inlined_call_operand.vmem [shape: f32[2,128,32], index: 1, kind: input, shape index: {}]   ;;  %s2037_s2 = inlined_call_operand.vmem [shape: f32[2,128,32], index: 2, kind: input, shape index: {}]   ;;  %s2038_s3 = inlined_call_operand.vmem [shape: f32[2,128,32], index: 3, kind: output, shape index: {0}]   ;;  %s2039_s4 = inlined_call_operand.hbm [shape: f32[2,128,128], index: 4, kind: output, shape index: {1}]  }
   0x1   :  { %12 = vsyncpa [#allocation3 + $0x1], 0  ;;  %s1628_s15 = smov 0   ;;  %s1630_s16 = smov 0  }
   0x2   :  { %s1632_s17 = smov 0   ;;  %s1634_s18 = smov 0  }
   0x3   :  { %s1636_s19 = smov 0   ;;  %s1638_s20 = smov 0  }
   0x4 LB: > { %s1087_s21 = sadd.s32 4294967295, %s1598_s20   ;;  %s1088_s22 = sadd.s32 4294967294, %s1598_s20   ;;  %s1598_s20 = sphi %s1638_s20, %s18_s20   ;;  %s1594_s19 = sphi %s1636_s19, %s2048_s19   ;;  %s1590_s18 = sphi %s1634_s18, %s2047_s18   ;;  %s1586_s17 = sphi %s1632_s17, %s2046_s17   ;;  %s1582_s16 = sphi %s1630_s16, %s2045_s16   ;;  %s1578_s15 = sphi %s1628_s15, %s2044_s15  }
   0x5   : > { %s30_s23 = sadd.s32 1, %s1594_s19  ;;  %s147_s24 = sadd.s32 1, %s1586_s17 }
   0x6   : > { %p32_p0 = scmp.ge.s32.totalorder %s30_s23, 2  ;;  %p157_p1 = scmp.ne.s32.totalorder %s1586_s17, %s1582_s16 }
   0x7   : > { %p158_p2 = scmp.eq.s32.totalorder %s1087_s21, 1  ;;  %p163_p3 = scmp.ne.s32.totalorder %s1582_s16, %s1578_s15 }
   0x8   : > { %s2050_s23 = smov (%p32_p0, %s30_s23), 0  ;;  %p164_p5 = scmp.eq.s32.totalorder %s1088_s22, 1 }
   0x9   : > { %p1668_p4 = por %p158_p2, %p157_p1  ;;  %s142_s26 = ssub.s32 %s1594_s19, %s2050_s23 }
   0xa   : > { %p1091_p6 = scmp.ge.s32.totalorder %s1598_s20, 1  ;;  %p145_p7 = scmp.eq.s32.totalorder %s142_s26, 0 }
   0xb   : > { %p1675_p8 = por %p164_p5, %p163_p3  ;;  %p211_p9 = scmp.lt.s32.totalorder %s1598_s20, 3 }
   0xc   : > { %s1681_s28 = scalar_select %p145_p7, %s1586_s17, %s147_s24  }
   0xd   : > { %p212_p10 = pnand %p1091_p6, %p211_p9 }
   0xe   : > { %p261_p11 = scmp.lt.s32.totalorder (!%p212_p10), %s1590_s18, 1  ;;  %vm355_vm0 = vcmask (!%p212_p10), 261120   ;;  %s257_s14 = sand.u32 (!%p212_p10), 1, %s1582_s16  }
   0xf   : > { %215 = sbr.rel (%p212_p10) target bundleno = 864 (0x360), region = 32  ;;  %vm1695_vm1 = vmpackc.low (!%p212_p10), %vm355_vm0, %vm355_vm0  ;;  %s1092_s21 = sshll.u32 (!%p212_p10), %s257_s14, 7 }
  0x10   : > { %s1907_s22 = scalar_lea.vmem (!%p212_p10), [#allocation2], %s1092_s21  ;;  %s1142_s24 = sshll.u32 (!%p212_p10), %s1590_s18, 11 }
  0x11   : > { %s947_s26 = sshll.u32 (!%p212_p10), %s1907_s22, 4  ;;  %s1945_s6 = scalar_lea.hbm (!%p212_p10), %s2039_s4, %s1142_s24  ;;  %s1947_s26 = int_to_ptr.vmem [resolvable:$true] %s947_s26 }
  0x12   : > { %s1520_s8 = scalar_lea.vmem (!%p212_p10), %s1947_s26, 2048 }
  0x13   : > { %p1521_p12 = scmp.ne.s32.totalorder (!%p212_p10), %s1947_s26, %s1520_s8 }
  0x15   : > { %p1522_p13 = pnand (!%p212_p10), %p1521_p12, %p1668_p4 }
  0x16   : > { %s262_s29 = scalar_select %p261_p11, %s1590_s18, 1 }
  0x17   : > { %p1523_p0 = pneg %p1522_p13  ;;  %s1600_s18 = smov [#allocation2]  }
  0x18   : > { %s1685_s30 = sshll.u32 %s262_s29, 7  ;;  %s1524_s9 = sshll.u32 %s1600_s18, 4  ;;  %s1525_s9 = int_to_ptr.vmem [resolvable:$false] %s1524_s9 }
  0x19   : > { %s1691_s7 = scalar_lea.vmem %s2036_s1, %s1685_s30  ;;  %s1707_s10 = scalar_lea.vmem %s2035_s0, %s1685_s30 }
  0x1a   : > { %v323_v1 = vld [vmem:[%s1691_s7] sm:$0xff]  ;;  %v324_v2 = vld [vmem:[%s1691_s7 + $0x8] sm:$0xff]  ;;  %v325_v3 = vld [vmem:[%s1691_s7 + $0x10] sm:$0xff]  ;;  %s1825_s13 = scalar_lea.vmem %s2037_s2, %s1685_s30  ;;  %p1527_p1 = scmp.lt.s32.totalorder %s1947_s26, %s1525_s9 }
  0x1b   : > { %v1319_v4 = vpack.c.bf16 %v324_v2, %v323_v1  ;;  %v326_v5 = vld [vmem:[%s1691_s7 + $0x18] sm:$0xff]  ;;  %v291_v7 = vld [vmem:[%s1707_s10] sm:$0xff]  ;;  %v328_v9 = vld [vmem:[%s1691_s7 + $0x28] sm:$0xff] }
  0x1c   : > { %v1325_v6 = vpack.c.bf16 %v326_v5, %v325_v3  ;;  %v327_v8 = vld [vmem:[%s1691_s7 + $0x20] sm:$0xff]  ;;  %v307_v10 = vmul.f32 0.17677669, %v291_v7  ;;  %v329_v12 = vld [vmem:[%s1691_s7 + $0x30] sm:$0xff]  ;;  %v330_v13 = vld [vmem:[%s1691_s7 + $0x38] sm:$0xff] }
  0x1d   : > { %1321 = vmatprep.subr.msk.bf16.mxu0 %vm1695_vm1, %v1319_v4  ;;  %v1331_v11 = vpack.c.bf16 %v328_v9, %v327_v8  ;;  %v1337_v14 = vpack.c.bf16 %v330_v13, %v329_v12  ;;  %v331_v15 = vld [vmem:[%s1691_s7 + $0x40] sm:$0xff]  ;;  %v332_v16 = vld [vmem:[%s1691_s7 + $0x48] sm:$0xff]  ;;  %v333_v18 = vld [vmem:[%s1691_s7 + $0x50] sm:$0xff] }
  0x1e   : > { %1324 = vmatpush3.bf16.xpose.msk.msra.mxu0 %vm1695_vm1, %v1319_v4  ;;  %1239 = vmatprep.mubr.msk.f32.mxu0 %vm355_vm0, %v307_v10  ;;  %v1343_v17 = vpack.c.bf16 %v332_v16, %v331_v15  ;;  %v334_v19 = vld [vmem:[%s1691_s7 + $0x58] sm:$0xff]  ;;  %v335_v21 = vld [vmem:[%s1691_s7 + $0x60] sm:$0xff]  ;;  %v336_v22 = vld [vmem:[%s1691_s7 + $0x68] sm:$0xff] }
  0x1f   : > { %1327 = vmatprep.subr.msk.bf16.mxu0 %vm1695_vm1, %v1325_v6  ;;  %v1349_v20 = vpack.c.bf16 %v334_v19, %v333_v18  ;;  %v1355_v23 = vpack.c.bf16 %v336_v22, %v335_v21  ;;  %v337_v24 = vld [vmem:[%s1691_s7 + $0x70] sm:$0xff]  ;;  %v338_v25 = vld [vmem:[%s1691_s7 + $0x78] sm:$0xff]  ;;  %v292_v27 = vld [vmem:[%s1707_s10 + $0x8] sm:$0xff]  ;;  %s1951_s7 = scalar_lea.sflag [#allocation3], %s257_s14 }
  0x20   : > { %v1361_v26 = vpack.c.bf16 %v338_v25, %v337_v24  ;;  %v293_v28 = vld [vmem:[%s1707_s10 + $0x10] sm:$0xff]  ;;  %v308_v29 = vmul.f32 0.17677669, %v292_v27  ;;  %v294_v31 = vld [vmem:[%s1707_s10 + $0x18] sm:$0xff]  ;;  %v295_v32 = vld [vmem:[%s1707_s10 + $0x20] sm:$0xff] }
  0x21   : > { %v309_v30 = vmul.f32 0.17677669, %v293_v28  ;;  %v310_v33 = vmul.f32 0.17677669, %v294_v31  ;;  %v311_v34 = vmul.f32 0.17677669, %v295_v32 }
  0x22   : > { %v296_v35 = vld [vmem:[%s1707_s10 + $0x28] sm:$0xff]  ;;  %v297_v36 = vld [vmem:[%s1707_s10 + $0x30] sm:$0xff]  ;;  %v298_v39 = vld [vmem:[%s1707_s10 + $0x38] sm:$0xff] }
  0x23   : > { %v312_v37 = vmul.f32 0.17677669, %v296_v35  ;;  %v313_v38 = vmul.f32 0.17677669, %v297_v36  ;;  %v299_v40 = vld [vmem:[%s1707_s10 + $0x40] sm:$0xff]  ;;  %v300_v43 = vld [vmem:[%s1707_s10 + $0x48] sm:$0xff] }
  0x24   : > { %v314_v41 = vmul.f32 0.17677669, %v298_v39  ;;  %v315_v42 = vmul.f32 0.17677669, %v299_v40  ;;  %v301_v44 = vld [vmem:[%s1707_s10 + $0x50] sm:$0xff]  ;;  %v302_v47 = vld [vmem:[%s1707_s10 + $0x58] sm:$0xff] }
  0x25   : > { %v316_v45 = vmul.f32 0.17677669, %v300_v43  ;;  %v317_v46 = vmul.f32 0.17677669, %v301_v44  ;;  %v303_v48 = vld [vmem:[%s1707_s10 + $0x60] sm:$0xff]  ;;  %v304_v51 = vld [vmem:[%s1707_s10 + $0x68] sm:$0xff] }
  0x26   : > { %1330 = vmatpush3.bf16.xpose.msk.msra.mxu0 %vm1695_vm1, %v1325_v6  ;;  %v318_v49 = vmul.f32 0.17677669, %v302_v47  ;;  %v319_v50 = vmul.f32 0.17677669, %v303_v48  ;;  %v305_v52 = vld [vmem:[%s1707_s10 + $0x70] sm:$0xff]  ;;  %v306_v55 = vld [vmem:[%s1707_s10 + $0x78] sm:$0xff] }
  0x27   : > { %1333 = vmatprep.subr.msk.bf16.mxu0 %vm1695_vm1, %v1331_v11  ;;  %v320_v53 = vmul.f32 0.17677669, %v304_v51  ;;  %v321_v54 = vmul.f32 0.17677669, %v305_v52  ;;  %v322_v56 = vmul.f32 0.17677669, %v306_v55 }
  0x28   : > { %v339_v9 = vld [vmem:[%s1825_s13] sm:$0xff]  ;;  %v340_v10 = vld [vmem:[%s1825_s13 + $0x8] sm:$0xff]  ;;  %v342_v13 = vld [vmem:[%s1825_s13 + $0x18] sm:$0xff]  ;;  %s1526_s10 = scalar_lea.vmem %s1525_s9, 4096 }
  0x29   : > { %v1367_v12 = vpack.c.bf16 %v340_v10, %v339_v9  ;;  %v343_v15 = vld [vmem:[%s1825_s13 + $0x20] sm:$0xff]  ;;  %v344_v16 = vld [vmem:[%s1825_s13 + $0x28] sm:$0xff]  ;;  %v345_v18 = vld [vmem:[%s1825_s13 + $0x30] sm:$0xff]  ;;  %p1528_p2 = scmp.lt.s32.totalorder %s1526_s10, %s1520_s8 }
  0x2a   : > { %v346_v19 = vld [vmem:[%s1825_s13 + $0x38] sm:$0xff] }
  0x2b   : > { %1368 = vmatprep.subr.bf16.mxu1 %v1367_v12  ;;  %p1529_p3 = por %p1528_p2, %p1527_p1 }
  0x2c   : > { %1370 = vmatpush3.bf16.msra.mxu1 %v1367_v12 }
  0x2d   : > { %p1530_p5 = pnand %p1529_p3, %p1523_p0 }
  0x2e   : > { %1336 = vmatpush3.bf16.xpose.msk.msra.mxu0 %vm1695_vm1, %v1331_v11  ;;  %v341_v11 = vld [vmem:[%s1825_s13 + $0x10] sm:$0xff] }
  0x2f   : > { %1339 = vmatprep.subr.msk.bf16.mxu0 %vm1695_vm1, %v1337_v14 }
  0x36   : > { %1342 = vmatpush3.bf16.xpose.msk.msra.mxu0 %vm1695_vm1, %v1337_v14  ;;  %v1371_v14 = vpack.c.bf16 %v342_v13, %v341_v11  ;;  %v348_v11 = vld [vmem:[%s1825_s13 + $0x48] sm:$0xff] }
  0x37   : > { %1345 = vmatprep.subr.msk.bf16.mxu0 %vm1695_vm1, %v1343_v17 }
  0x38   : > { %1372 = vmatprep.subr.bf16.mxu1 %v1371_v14 }
  0x39   : > { %1374 = vmatpush3.bf16.msra.mxu1 %v1371_v14 }
  0x3e   : > { %1348 = vmatpush3.bf16.xpose.msk.msra.mxu0 %vm1695_vm1, %v1343_v17  ;;  %v1375_v17 = vpack.c.bf16 %v344_v16, %v343_v15 }
  0x3f   : > { %1351 = vmatprep.subr.msk.bf16.mxu0 %vm1695_vm1, %v1349_v20 }
  0x40   : > { %1376 = vmatprep.subr.bf16.mxu1 %v1375_v17 }
  0x41   : > { %1378 = vmatpush3.bf16.msra.mxu1 %v1375_v17 }
  0x46   : > { %1354 = vmatpush3.bf16.xpose.msk.msra.mxu0 %vm1695_vm1, %v1349_v20  ;;  %v1379_v20 = vpack.c.bf16 %v346_v19, %v345_v18  ;;  %v350_v18 = vld [vmem:[%s1825_s13 + $0x58] sm:$0xff] }
  0x47   : > { %1357 = vmatprep.subr.msk.bf16.mxu0 %vm1695_vm1, %v1355_v23 }
  0x48   : > { %1380 = vmatprep.subr.bf16.mxu1 %v1379_v20 }
  0x49   : > { %1382 = vmatpush3.bf16.msra.mxu1 %v1379_v20 }
  0x4e   : > { %1360 = vmatpush3.bf16.xpose.msk.msra.mxu0 %vm1695_vm1, %v1355_v23 }
  0x4f   : > { %1363 = vmatprep.subr.msk.bf16.mxu0 %vm1695_vm1, %v1361_v26 }
  0x56   : > { %1366 = vmatpush3.bf16.xpose.msk.msra.mxu0 %vm1695_vm1, %v1361_v26 }
  0x5d   : > { %1240 = vmatmul.mubr.msk.f32.vlgmr.msra.gmra.mrb[0].mxu0 %vm355_vm0, %v308_v29 }
  0x5e   : > { %1242 = vmatprep.mubr.msk.f32.mxu0 %vm355_vm0, %v309_v30 }
  0x61   : > { %1243 = vmatmul.mubr.msk.f32.gmra.mrb[2].mxu0 %vm355_vm0, %v310_v33 }
  0x62   : > { %1245 = vmatprep.mubr.msk.f32.mxu0 %vm355_vm0, %v311_v34 }
  0x65   : > { %1246 = vmatmul.mubr.msk.f32.gmra.mrb[4].mxu0 %vm355_vm0, %v312_v37 }
  0x66   : > { %1248 = vmatprep.mubr.msk.f32.mxu0 %vm355_vm0, %v313_v38 }
  0x69   : > { %1249 = vmatmul.mubr.msk.f32.gmra.mrb[6].mxu0 %vm355_vm0, %v314_v41 }
  0x6a   : > { %1251 = vmatprep.mubr.msk.f32.mxu0 %vm355_vm0, %v315_v42 }
  0x6d   : > { %1252 = vmatmul.mubr.msk.f32.gmra.mrb[8].mxu0 %vm355_vm0, %v316_v45 }
  0x6e   : > { %1254 = vmatprep.mubr.msk.f32.mxu0 %vm355_vm0, %v317_v46 }
  0x71   : > { %1255 = vmatmul.mubr.msk.f32.gmra.mrb[10].mxu0 %vm355_vm0, %v318_v49 }
  0x72   : > { %1257 = vmatprep.mubr.msk.f32.mxu0 %vm355_vm0, %v319_v50 }
  0x75   : > { %1258 = vmatmul.mubr.msk.f32.gmra.mrb[12].mxu0 %vm355_vm0, %v320_v53 }
  0x76   : > { %1260 = vmatprep.mubr.msk.f32.mxu0 %vm355_vm0, %v321_v54 }
  0x79   : > { %1261 = vmatmul.mubr.msk.f32.gmra.mrb[14].mxu0 %vm355_vm0, %v322_v56 }
 0x130   : > { %v1241_v57 = vpop.f32.mrb[0].mxu0 }
 0x131   : > { %v518_v58 = vpop.f32.mrb[1].mxu0 }
 0x132   : > { %597 = vmax.xlane.f32.xlu0 %v518_v58 }
 0x134   : > { %v1785_v59 = vpop.f32.mrb[2].mxu0 }
 0x135   : > { %v528_v60 = vpop.f32.mrb[3].mxu0 }
 0x136   : > { %599 = vmax.xlane.f32.xlu0 %v1241_v57  ;;  %601 = vmax.xlane.f32.xlu1 %v528_v60 }
 0x138   : > { %v1787_v61 = vpop.f32.mrb[4].mxu0 }
 0x139   : > { %v538_v62 = vpop.f32.mrb[5].mxu0 }
 0x13a   : > { %603 = vmax.xlane.f32.xlu1 %v1785_v59  ;;  %605 = vmax.xlane.f32.xlu0 %v538_v62 }
 0x13c   : > { %v1790_v63 = vpop.f32.mrb[6].mxu0 }
 0x13d   : > { %v1792_v0 = vpop.f32.mrb[7].mxu0 }
 0x13e   : > { %607 = vmax.xlane.f32.xlu1 %v1787_v61  ;;  %609 = vmax.xlane.f32.xlu0 %v1792_v0 }
 0x140   : > { %v1796_v1 = vpop.f32.mrb[8].mxu0 }
 0x141   : > { %v1798_v2 = vpop.f32.mrb[9].mxu0 }
 0x142   : > { %611 = vmax.xlane.f32.xlu1 %v1790_v63  ;;  %613 = vmax.xlane.f32.xlu0 %v1798_v2 }
 0x144   : > { %v1802_v3 = vpop.f32.mrb[10].mxu0 }
 0x145   : > { %v1804_v4 = vpop.f32.mrb[11].mxu0 }
 0x146   : > { %615 = vmax.xlane.f32.xlu1 %v1796_v1  ;;  %617 = vmax.xlane.f32.xlu0 %v1804_v4 }
 0x148   : > { %v1808_v5 = vpop.f32.mrb[12].mxu0 }
 0x149   : > { %v1810_v6 = vpop.f32.mrb[13].mxu0 }
 0x14a   : > { %619 = vmax.xlane.f32.xlu1 %v1802_v3  ;;  %621 = vmax.xlane.f32.xlu0 %v1810_v6 }
 0x14c   : > { %v1814_v7 = vpop.f32.mrb[14].mxu0 }
 0x14d   : > { %v1816_v8 = vpop.f32.mrb[15].mxu0 }
 0x14e   : > { %623 = vmax.xlane.f32.xlu1 %v1808_v5  ;;  %625 = vmax.xlane.f32.xlu0 %v1816_v8 }
 0x152   : > { %627 = vmax.xlane.f32.xlu1 %v1814_v7 }
 0x1bf   : > { %v598_v21 = vpop.xlane.xlu0 %597 }
 0x1c0   : > { %v629_v22 = vsub.f32 %v518_v58, %v598_v21 }
 0x1c2   : > { %v645_v23 = vmul.f32 1.442695, %v629_v22 }
 0x1c3   : > { %v600_v24 = vpop.xlane.xlu0 %599  ;;  %v602_v25 = vpop.xlane.xlu1 %601 }
 0x1c4   : > { %1456 = vpow2.f32 %v645_v23  ;;  %v630_v26 = vsub.f32 %v1241_v57, %v600_v24  ;;  %v631_v27 = vsub.f32 %v528_v60, %v602_v25  ;;  %v352_v23 = vld [vmem:[%s1825_s13 + $0x68] sm:$0xff] }
 0x1c6   : > { %v647_v28 = vmul.f32 1.442695, %v630_v26  ;;  %v649_v29 = vmul.f32 1.442695, %v631_v27  ;;  %v353_v27 = vld [vmem:[%s1825_s13 + $0x70] sm:$0xff] }
 0x1c7   : > { %v604_v30 = vpop.xlane.xlu1 %603  ;;  %v606_v31 = vpop.xlane.xlu0 %605 }
 0x1c8   : > { %1458 = vpow2.f32 %v647_v28  ;;  %v632_v32 = vsub.f32 %v1785_v59, %v604_v30  ;;  %v633_v33 = vsub.f32 %v538_v62, %v606_v31  ;;  %v354_v28 = vld [vmem:[%s1825_s13 + $0x78] sm:$0xff] }
 0x1c9   : > { %1460 = vpow2.f32 %v649_v29  ;;  %v1395_v29 = vpack.c.bf16 %v354_v28, %v353_v27 }
 0x1ca   : > { %v651_v34 = vmul.f32 1.442695, %v632_v32  ;;  %v653_v35 = vmul.f32 1.442695, %v633_v33 }
 0x1cb   : > { %v608_v36 = vpop.xlane.xlu1 %607  ;;  %v610_v37 = vpop.xlane.xlu0 %609 }
 0x1cc   : > { %1462 = vpow2.f32 %v651_v34  ;;  %v634_v38 = vsub.f32 %v1787_v61, %v608_v36  ;;  %v635_v39 = vsub.f32 %v1792_v0, %v610_v37 }
 0x1cd   : > { %1464 = vpow2.f32 %v653_v35 }
 0x1ce   : > { %v1838_v40 = vpop.eup %1456  ;;  %v655_v41 = vmul.f32 1.442695, %v634_v38  ;;  %v657_v42 = vmul.f32 1.442695, %v635_v39 }
 0x1cf   : > { %v612_v43 = vpop.xlane.xlu1 %611  ;;  %v614_v44 = vpop.xlane.xlu0 %613  ;;  %677 = vadd.xlane.f32.xlu0 %v1838_v40 }
 0x1d0   : > { %1466 = vpow2.f32 %v655_v41  ;;  %v636_v45 = vsub.f32 %v1790_v63, %v612_v43  ;;  %v637_v46 = vsub.f32 %v1798_v2, %v614_v44 }
 0x1d1   : > { %1468 = vpow2.f32 %v657_v42 }
 0x1d2   : > { %v1843_v47 = vpop.eup %1458  ;;  %v659_v48 = vmul.f32 1.442695, %v636_v45  ;;  %v661_v49 = vmul.f32 1.442695, %v637_v46 }
 0x1d3   : > { %v1845_v50 = vpop.eup %1460  ;;  %v616_v51 = vpop.xlane.xlu1 %615  ;;  %679 = vadd.xlane.f32.xlu1 %v1843_v47 }
 0x1d4   : > { %v618_v52 = vpop.xlane.xlu0 %617  ;;  %1470 = vpow2.f32 %v659_v48  ;;  %v638_v53 = vsub.f32 %v1796_v1, %v616_v51  ;;  %681 = vadd.xlane.f32.xlu0 %v1845_v50 }
 0x1d5   : > { %v639_v54 = vsub.f32 %v1804_v4, %v618_v52  ;;  %1472 = vpow2.f32 %v661_v49 }
 0x1d6   : > { %v1851_v55 = vpop.eup %1462  ;;  %v663_v56 = vmul.f32 1.442695, %v638_v53 }
 0x1d7   : > { %v665_v57 = vmul.f32 1.442695, %v639_v54  ;;  %v1853_v58 = vpop.eup %1464  ;;  %v620_v59 = vpop.xlane.xlu1 %619  ;;  %683 = vadd.xlane.f32.xlu1 %v1851_v55 }
 0x1d8   : > { %v622_v60 = vpop.xlane.xlu0 %621  ;;  %1474 = vpow2.f32 %v663_v56  ;;  %v640_v61 = vsub.f32 %v1802_v3, %v620_v59  ;;  %685 = vadd.xlane.f32.xlu0 %v1853_v58 }
 0x1d9   : > { %v641_v62 = vsub.f32 %v1810_v6, %v622_v60  ;;  %1476 = vpow2.f32 %v665_v57  ;;  %v347_v6 = vld [vmem:[%s1825_s13 + $0x40] sm:$0xff] }
 0x1da   : > { %v1859_v63 = vpop.eup %1466  ;;  %v667_v0 = vmul.f32 1.442695, %v640_v61  ;;  %v1383_v12 = vpack.c.bf16 %v348_v11, %v347_v6 }
 0x1db   : > { %v669_v1 = vmul.f32 1.442695, %v641_v62  ;;  %v1861_v2 = vpop.eup %1468  ;;  %v624_v4 = vpop.xlane.xlu1 %623  ;;  %687 = vadd.xlane.f32.xlu1 %v1859_v63 }
 0x1dc   : > { %v626_v9 = vpop.xlane.xlu0 %625  ;;  %1478 = vpow2.f32 %v667_v0  ;;  %v642_v10 = vsub.f32 %v1808_v5, %v624_v4  ;;  %689 = vadd.xlane.f32.xlu0 %v1861_v2  ;;  %1384 = vmatprep.subr.bf16.mxu1 %v1383_v12 }
 0x1dd   : > { %v643_v3 = vsub.f32 %v1816_v8, %v626_v9  ;;  %1480 = vpow2.f32 %v669_v1  ;;  %1386 = vmatpush3.bf16.msra.mxu1 %v1383_v12  ;;  %v349_v8 = vld [vmem:[%s1825_s13 + $0x50] sm:$0xff] }
 0x1de   : > { %v1869_v13 = vpop.eup %1470  ;;  %v671_v14 = vmul.f32 1.442695, %v642_v10  ;;  %v1387_v19 = vpack.c.bf16 %v350_v18, %v349_v8 }
 0x1df   : > { %v673_v15 = vmul.f32 1.442695, %v643_v3  ;;  %v1871_v16 = vpop.eup %1472  ;;  %691 = vadd.xlane.f32.xlu1 %v1869_v13  ;;  %v628_v17 = vpop.xlane.xlu1 %627 }
 0x1e0   : > { %1482 = vpow2.f32 %v671_v14  ;;  %v644_v5 = vsub.f32 %v1814_v7, %v628_v17  ;;  %693 = vadd.xlane.f32.xlu0 %v1871_v16  ;;  %1388 = vmatprep.subr.bf16.mxu1 %v1387_v19  ;;  %v351_v7 = vld [vmem:[%s1825_s13 + $0x60] sm:$0xff] }
 0x1e1   : > { %1484 = vpow2.f32 %v673_v15  ;;  %1390 = vmatpush3.bf16.msra.mxu1 %v1387_v19  ;;  %v1391_v24 = vpack.c.bf16 %v352_v23, %v351_v7 }
 0x1e2   : > { %v1878_v20 = vpop.eup %1474  ;;  %v675_v21 = vmul.f32 1.442695, %v644_v5 }
 0x1e3   : > { %v1880_v22 = vpop.eup %1476  ;;  %695 = vadd.xlane.f32.xlu1 %v1878_v20  ;;  %1392 = vmatprep.subr.bf16.mxu1 %v1391_v24 }
 0x1e4   : > { %1486 = vpow2.f32 %v675_v21  ;;  %697 = vadd.xlane.f32.xlu0 %v1880_v22 }
 0x1e5   : > { %1394 = vmatpush3.bf16.msra.mxu1 %v1391_v24 }
 0x1e6   : > { %v1886_v25 = vpop.eup %1478  ;;  %1396 = vmatprep.subr.bf16.mxu1 %v1395_v29 }
 0x1e7   : > { %v1888_v26 = vpop.eup %1480  ;;  %699 = vadd.xlane.f32.xlu1 %v1886_v25 }
 0x1e8   : > { %701 = vadd.xlane.f32.xlu0 %v1888_v26 }
 0x1e9   : > { %1398 = vmatpush3.bf16.msra.mxu1 %v1395_v29 }
 0x1ea   : > { %v1894_v30 = vpop.eup %1482 }
 0x1eb   : > { %v1896_v31 = vpop.eup %1484  ;;  %703 = vadd.xlane.f32.xlu1 %v1894_v30 }
 0x1ec   : > { %705 = vadd.xlane.f32.xlu0 %v1896_v31 }
 0x1ee   : > { %v1900_v32 = vpop.eup %1486 }
 0x1ef   : > { %707 = vadd.xlane.f32.xlu1 %v1900_v32 }
 0x25c   : > { %v678_v33 = vpop.xlane.xlu0 %677 }
 0x25d   : > { %1488 = vrcp.f32 %v678_v33 }
 0x260   : > { %v680_v34 = vpop.xlane.xlu1 %679 }
 0x261   : > { %1490 = vrcp.f32 %v680_v34  ;;  %v682_v35 = vpop.xlane.xlu0 %681 }
 0x262   : > { %1492 = vrcp.f32 %v682_v35 }
 0x264   : > { %v684_v36 = vpop.xlane.xlu1 %683 }
 0x265   : > { %1494 = vrcp.f32 %v684_v36  ;;  %v686_v37 = vpop.xlane.xlu0 %685 }
 0x266   : > { %1496 = vrcp.f32 %v686_v37 }
 0x267   : > { %v1489_v38 = vpop.eup %1488 }
 0x268   : > { %v688_v39 = vpop.xlane.xlu1 %687  ;;  %v725_v41 = vmul.f32 %v1489_v38, %v1838_v40 }
 0x269   : > { %1498 = vrcp.f32 %v688_v39  ;;  %v690_v42 = vpop.xlane.xlu0 %689 }
 0x26a   : > { %1500 = vrcp.f32 %v690_v42  ;;  %741 = vst [vmem:[%s1907_s22] sm:$0xff] %v725_v41  ;;  %1295 = vmatprep.mubr.f32.mxu1 %v725_v41 }
 0x26b   : > { %v1491_v43 = vpop.eup %1490 }
 0x26c   : > { %v1493_v44 = vpop.eup %1492  ;;  %v692_v45 = vpop.xlane.xlu1 %691  ;;  %v726_v46 = vmul.f32 %v1491_v43, %v1843_v47 }
 0x26d   : > { %1502 = vrcp.f32 %v692_v45  ;;  %v694_v48 = vpop.xlane.xlu0 %693  ;;  %v727_v40 = vmul.f32 %v1493_v44, %v1845_v50 }
 0x26e   : > { %1504 = vrcp.f32 %v694_v48  ;;  %742 = vst [vmem:[%s1907_s22 + $0x8] sm:$0xff] %v726_v46  ;;  %1296 = vmatmul.mubr.f32.vlgmr.msra.gmra.mrb[0].mxu1 %v726_v46 }
 0x26f   : > { %v1495_v49 = vpop.eup %1494  ;;  %743 = vst [vmem:[%s1907_s22 + $0x10] sm:$0xff] %v727_v40  ;;  %1298 = vmatprep.mubr.f32.mxu1 %v727_v40 }
 0x270   : > { %v1497_v51 = vpop.eup %1496  ;;  %v696_v52 = vpop.xlane.xlu1 %695  ;;  %v728_v53 = vmul.f32 %v1495_v49, %v1851_v55 }
 0x271   : > { %1506 = vrcp.f32 %v696_v52  ;;  %v698_v54 = vpop.xlane.xlu0 %697  ;;  %v729_v47 = vmul.f32 %v1497_v51, %v1853_v58 }
 0x272   : > { %1508 = vrcp.f32 %v698_v54  ;;  %744 = vst [vmem:[%s1907_s22 + $0x18] sm:$0xff] %v728_v53  ;;  %1299 = vmatmul.mubr.f32.gmra.mrb[2].mxu1 %v728_v53 }
 0x273   : > { %v1499_v50 = vpop.eup %1498  ;;  %745 = vst [vmem:[%s1907_s22 + $0x20] sm:$0xff] %v729_v47  ;;  %1301 = vmatprep.mubr.f32.mxu1 %v729_v47 }
 0x274   : > { %v1501_v56 = vpop.eup %1500  ;;  %v700_v57 = vpop.xlane.xlu1 %699  ;;  %v730_v59 = vmul.f32 %v1499_v50, %v1859_v63 }
 0x275   : > { %1510 = vrcp.f32 %v700_v57  ;;  %v702_v60 = vpop.xlane.xlu0 %701  ;;  %v731_v55 = vmul.f32 %v1501_v56, %v1861_v2 }
 0x276   : > { %1512 = vrcp.f32 %v702_v60  ;;  %746 = vst [vmem:[%s1907_s22 + $0x28] sm:$0xff] %v730_v59  ;;  %1302 = vmatmul.mubr.f32.gmra.mrb[4].mxu1 %v730_v59 }
 0x277   : > { %v1503_v58 = vpop.eup %1502  ;;  %747 = vst [vmem:[%s1907_s22 + $0x30] sm:$0xff] %v731_v55  ;;  %1304 = vmatprep.mubr.f32.mxu1 %v731_v55 }
 0x278   : > { %v1505_v61 = vpop.eup %1504  ;;  %v704_v62 = vpop.xlane.xlu1 %703  ;;  %v732_v0 = vmul.f32 %v1503_v58, %v1869_v13 }
 0x279   : > { %1514 = vrcp.f32 %v704_v62  ;;  %v706_v1 = vpop.xlane.xlu0 %705  ;;  %v733_v63 = vmul.f32 %v1505_v61, %v1871_v16 }
 0x27a   : > { %1516 = vrcp.f32 %v706_v1  ;;  %748 = vst [vmem:[%s1907_s22 + $0x38] sm:$0xff] %v732_v0  ;;  %1305 = vmatmul.mubr.f32.gmra.mrb[6].mxu1 %v732_v0 }
 0x27b   : > { %v1507_v2 = vpop.eup %1506  ;;  %749 = vst [vmem:[%s1907_s22 + $0x40] sm:$0xff] %v733_v63  ;;  %1307 = vmatprep.mubr.f32.mxu1 %v733_v63 }
 0x27c   : > { %v1509_v4 = vpop.eup %1508  ;;  %v708_v9 = vpop.xlane.xlu1 %707  ;;  %v734_v10 = vmul.f32 %v1507_v2, %v1878_v20 }
 0x27d   : > { %1518 = vrcp.f32 %v708_v9  ;;  %v735_v3 = vmul.f32 %v1509_v4, %v1880_v22 }
 0x27e   : > { %750 = vst [vmem:[%s1907_s22 + $0x48] sm:$0xff] %v734_v10  ;;  %1308 = vmatmul.mubr.f32.gmra.mrb[8].mxu1 %v734_v10 }
 0x27f   : > { %v1511_v6 = vpop.eup %1510  ;;  %751 = vst [vmem:[%s1907_s22 + $0x50] sm:$0xff] %v735_v3  ;;  %1310 = vmatprep.mubr.f32.mxu1 %v735_v3 }
 0x280   : > { %v1513_v11 = vpop.eup %1512  ;;  %v736_v12 = vmul.f32 %v1511_v6, %v1886_v25 }
 0x281   : > { %v737_v13 = vmul.f32 %v1513_v11, %v1888_v26 }
 0x282   : > { %752 = vst [vmem:[%s1907_s22 + $0x58] sm:$0xff] %v736_v12  ;;  %1311 = vmatmul.mubr.f32.gmra.mrb[10].mxu1 %v736_v12 }
 0x283   : > { %v1515_v14 = vpop.eup %1514  ;;  %753 = vst [vmem:[%s1907_s22 + $0x60] sm:$0xff] %v737_v13  ;;  %1313 = vmatprep.mubr.f32.mxu1 %v737_v13 }
 0x284   : > { %v1517_v15 = vpop.eup %1516  ;;  %v738_v16 = vmul.f32 %v1515_v14, %v1894_v30 }
 0x285   : > { %v739_v17 = vmul.f32 %v1517_v15, %v1896_v31 }
 0x286   : > { %754 = vst [vmem:[%s1907_s22 + $0x68] sm:$0xff] %v738_v16  ;;  %1314 = vmatmul.mubr.f32.gmra.mrb[12].mxu1 %v738_v16 }
 0x287   : > { %v1519_v5 = vpop.eup %1518  ;;  %755 = vst [vmem:[%s1907_s22 + $0x70] sm:$0xff] %v739_v17  ;;  %1316 = vmatprep.mubr.f32.mxu1 %v739_v17 }
 0x288   : > { %v740_v8 = vmul.f32 %v1519_v5, %v1900_v32 }
 0x28a   : > { %756 = vst [vmem:[%s1907_s22 + $0x78] sm:$0xff] %v740_v8  ;;  %1317 = vmatmul.mubr.f32.gmra.mrb[14].mxu1 %v740_v8 }
 0x28b   : > { %1533 = shalt.err (!%p1530_p5)
}
 0x28c   : > { %s1534_s11 = scalar_lea.hbm %s1945_s6, 2048  ;;  %s1538_s14 = scalar_lea.hbm %s2039_s4, 4096 }
 0x28d   : > { %p1535_p6 = scmp.ne.s32.totalorder %s1945_s6, %s1534_s11  ;;  %p1539_p10 = scmp.lt.u32.totalorder %s1945_s6, %s2039_s4 }
 0x28e   : > { %p1540_p11 = scmp.lt.u32.totalorder %s1538_s14, %s1534_s11  ;;  %p1542_p13 = scmp.lt.u32.totalorder %s1534_s11, %s1945_s6 }
 0x28f   : > { %p1536_p7 = pnand %p1535_p6, %p1668_p4 }
 0x290   : > { %p1541_p12 = por %p1540_p11, %p1539_p10 }
 0x291   : > { %p1537_p9 = pneg %p1536_p7 }
 0x292   : > { %p1543_p0 = por %p1542_p13, %p1541_p12 }
 0x294   : > { %p1544_p1 = pnand %p1543_p0, %p1537_p9 }
 0x296   : > { %1547 = shalt.err (!%p1544_p1)
}
 0x297   : > { %s1601_s24 = smov 128   ;;  %s1602_s29 = smov 8  }
 0x298   : > { %1399 = dma.vmem_to_hbm [thread:$0]  (%p1668_p4), %s1947_s26, 2048, %s1945_s6, %s1951_s7, %s1601_s24, %s1601_s24, %s1602_s29  }
 0x299   : > { %s1979_s18 = scalar_lea.vmem %s2038_s3, %s1685_s30 }
 0x341   : > { %v1297_v18 = vpop.f32.mrb[0].mxu1 }
 0x342   : > { %903 = vst.msk [vmem:[%s1979_s18 + $0x8] sm:$0xff] %vm355_vm0, %v1297_v18  ;;  %v823_v19 = vpop.f32.mrb[1].mxu1 }
 0x343   : > { %902 = vst.msk [vmem:[%s1979_s18] sm:$0xff] %vm355_vm0, %v823_v19 }
 0x345   : > { %v1300_v20 = vpop.f32.mrb[2].mxu1 }
 0x346   : > { %905 = vst.msk [vmem:[%s1979_s18 + $0x18] sm:$0xff] %vm355_vm0, %v1300_v20  ;;  %v833_v21 = vpop.f32.mrb[3].mxu1 }
 0x347   : > { %904 = vst.msk [vmem:[%s1979_s18 + $0x10] sm:$0xff] %vm355_vm0, %v833_v21 }
 0x349   : > { %v1303_v22 = vpop.f32.mrb[4].mxu1 }
 0x34a   : > { %907 = vst.msk [vmem:[%s1979_s18 + $0x28] sm:$0xff] %vm355_vm0, %v1303_v22  ;;  %v843_v7 = vpop.f32.mrb[5].mxu1 }
 0x34b   : > { %906 = vst.msk [vmem:[%s1979_s18 + $0x20] sm:$0xff] %vm355_vm0, %v843_v7 }
 0x34d   : > { %v1306_v23 = vpop.f32.mrb[6].mxu1 }
 0x34e   : > { %909 = vst.msk [vmem:[%s1979_s18 + $0x38] sm:$0xff] %vm355_vm0, %v1306_v23  ;;  %v853_v24 = vpop.f32.mrb[7].mxu1 }
 0x34f   : > { %908 = vst.msk [vmem:[%s1979_s18 + $0x30] sm:$0xff] %vm355_vm0, %v853_v24 }
 0x351   : > { %v1309_v25 = vpop.f32.mrb[8].mxu1 }
 0x352   : > { %911 = vst.msk [vmem:[%s1979_s18 + $0x48] sm:$0xff] %vm355_vm0, %v1309_v25  ;;  %v863_v26 = vpop.f32.mrb[9].mxu1 }
 0x353   : > { %910 = vst.msk [vmem:[%s1979_s18 + $0x40] sm:$0xff] %vm355_vm0, %v863_v26 }
 0x355   : > { %v1312_v27 = vpop.f32.mrb[10].mxu1 }
 0x356   : > { %913 = vst.msk [vmem:[%s1979_s18 + $0x58] sm:$0xff] %vm355_vm0, %v1312_v27  ;;  %v873_v28 = vpop.f32.mrb[11].mxu1 }
 0x357   : > { %912 = vst.msk [vmem:[%s1979_s18 + $0x50] sm:$0xff] %vm355_vm0, %v873_v28 }
 0x359   : > { %v1315_v29 = vpop.f32.mrb[12].mxu1 }
 0x35a   : > { %915 = vst.msk [vmem:[%s1979_s18 + $0x68] sm:$0xff] %vm355_vm0, %v1315_v29  ;;  %v883_v30 = vpop.f32.mrb[13].mxu1 }
 0x35b   : > { %914 = vst.msk [vmem:[%s1979_s18 + $0x60] sm:$0xff] %vm355_vm0, %v883_v30 }
 0x35d   : > { %v1318_v31 = vpop.f32.mrb[14].mxu1 }
 0x35e   : > { %917 = vst.msk [vmem:[%s1979_s18 + $0x78] sm:$0xff] %vm355_vm0, %v1318_v31  ;;  %v893_v32 = vpop.f32.mrb[15].mxu1 }
 0x35f   : > { %916 = vst.msk [vmem:[%s1979_s18 + $0x70] sm:$0xff] %vm355_vm0, %v893_v32 }
 0x360 PF: > { %p1405_p4 = scmp.ge.s32.totalorder %s1598_s20, 2  ;;  %s974_s25 = sand.u32 1, %s1578_s15  }
 0x361   : > { %s975_s30 = scalar_lea.sflag [#allocation3], %s974_s25 }
 0x362   : > { %p1402_p2 = pnand %p1405_p4, %p1675_p8 }
 0x364   : > { %1573 = dma.done.wait (!%p1402_p2), %s975_s30, 2048  }
 0x365   : > { %1575 = vsyncadd (!%p1402_p2), %s975_s30, 4294965248  ;;  %s18_s20 = sadd.s32 1, %s1598_s20   ;;  %s2044_s15 = smov %s1582_s16 }
 0x366   : > { %p15_p3 = scmp.ge.s32.totalorder %s18_s20, 4   ;;  %s2045_s16 = smov %s1586_s17 }
 0x367   : > { %s2046_s17 = smov %s1681_s28  ;;  %s2047_s18 = smov %s1594_s19 }
 0x368   : > { %s2048_s19 = smov %s2050_s23  ;;  %17 = sbr.rel (!%p15_p3) target bundleno = 4 (0x4), region = 85 }
 0x36f   :  { %980 = vsyncpa [#allocation3], 1 }
 0x370   :  { %982 = vsyncpa [#allocation3 + $0x1], 1 }

</bundles_post_ra>
